<compile_context>
chip_gen: v7x
topology: tpu7x:2x2x1
jax: 0.10.0
libtpu: 0.0.40
codegen_flags: <defaults>
</compile_context>

<pallas_src>
import math
import jax
import jax.numpy as jnp
from jax.experimental import pallas as pl
from jax.experimental.pallas import tpu as pltpu

# ---------------- config (small, deterministic) ----------------
B = 2          # batch
T = 8          # sequence length
C = 32         # n_embd
N_HEAD = 4     # n_head
HD = C // N_HEAD
BT = B * T                 # 16 rows after folding batch into sublanes
R = N_HEAD * BT            # 64 flattened (head, batch, token) rows
LN_EPS = 1e-5
INV_SQRT2 = 1.0 / math.sqrt(2.0)

# ---- packed parameter-slab layout (host packing & kernel slicing agree) ----
COL_FC = 0        # cols 0:128   : Wfc (LN2-folded), row BIAS_ROW holds bfc
COL_VP = 128      # cols 128:256 : Wv' = Wv @ Wattp per head (LN1-folded)
COL_Q = 256       # cols 256:288 : Wq (LN1-folded, 1/sqrt(HD) folded), bq
COL_K = 288       # cols 288:320 : Wk (LN1-folded), bk
COL_BATT = 128    # row BIAS_ROW, cols 128:160 : total attention-output bias
COL_BMP = 160     # row BIAS_ROW, cols 160:192 : MLP output-projection bias
COL_QSEL = 128    # rows MASK_ROW.., cols 128:160 : 0/1 q head-select mask
BIAS_ROW = 32
MASK_ROW = 40     # 8-aligned start for the (64, 64) additive attention mask
SLAB_ROWS = MASK_ROW + R      # 104
SLAB_COLS = 320


# ---------------- Pallas kernel ----------------
def block_kernel(x_ref, slab_ref, wmp_ref, o_ref):
    x = x_ref[...]                                        # (BT, C)

    # ---- static slices of the packed parameter slab ----
    w_fc = slab_ref[0:C, COL_FC:COL_FC + 4 * C]           # (32,128)
    w_att = slab_ref[0:C, COL_VP:SLAB_COLS]               # (32,192) [Wv'|Wq|Wk]
    b_fc = slab_ref[C:C + 1, COL_FC:COL_FC + 4 * C]       # (1,128)
    b_att = slab_ref[C:C + 1, COL_BATT:COL_BATT + C]      # (1,32)
    b_mp = slab_ref[C:C + 1, COL_BMP:COL_BMP + C]         # (1,32)
    b_q = slab_ref[C:C + 1, COL_Q:COL_Q + C]              # (1,32)
    b_k = slab_ref[C:C + 1, COL_K:COL_K + C]              # (1,32)
    mask_b = slab_ref[MASK_ROW:MASK_ROW + R, 0:R]         # (64,64) 0 / -1e30
    q_sel = slab_ref[MASK_ROW:MASK_ROW + R, COL_QSEL:COL_QSEL + C]  # (64,32)

    def norm(h):
        # normalize-only LayerNorm (affine folded into downstream weights);
        # centred two-pass variance for robustness.
        mu = jnp.mean(h, axis=-1, keepdims=True)
        hc = h - mu
        var = jnp.mean(hc * hc, axis=-1, keepdims=True)
        return hc * jax.lax.rsqrt(var + LN_EPS)

    # ---- attention branch: y = SelfAttention(LN1(x)) ----
    n1 = norm(x)                                          # (16,32)
    r = jnp.dot(n1, w_att, preferred_element_type=jnp.float32)       # (16,192)
    vproj = r[:, 0:4 * C]                 # (16,128): per-head V @ Wattp_h
    q = r[:, 4 * C:5 * C] + b_q           # (16,32); 1/sqrt(HD) already folded
    k = r[:, 5 * C:6 * C] + b_k           # (16,32)

    # Flatten heads along sublanes (row = head*BT + b*T + t) by replication;
    # a 0/1 head-select mask on q restricts each row block to its own head.
    q4 = jnp.concatenate([q, q, q, q], axis=0) * q_sel    # (64,32)
    k4 = jnp.concatenate([k, k, k, k], axis=0)            # (64,32)

    att = jax.lax.dot_general(q4, k4, (((1,), (1,)), ((), ())),
                              preferred_element_type=jnp.float32)    # (64,64)
    att = att + mask_b                                    # block-diag causal mask
    att = att - jnp.max(att, axis=-1, keepdims=True)
    p = jnp.exp(att)
    p = p * pl.reciprocal(jnp.sum(p, axis=-1, keepdims=True), approx=False)

    # Head-major sublane stack of the already-projected V, then one P@V matmul.
    v2 = jnp.concatenate([vproj[:, 0:C], vproj[:, C:2 * C],
                          vproj[:, 2 * C:3 * C], vproj[:, 3 * C:4 * C]],
                         axis=0)                          # (64,32)
    o2 = jnp.dot(p, v2, preferred_element_type=jnp.float32)          # (64,32)

    # Output projection is already folded into Wv': just sum the head blocks.
    y = (o2[0:BT] + o2[BT:2 * BT] + o2[2 * BT:3 * BT] + o2[3 * BT:4 * BT]
         + b_att)                                         # (16,32)
    x1 = x + y                                            # residual 1

    # ---- MLP branch: x = x1 + MLP(LN2(x1)) ----
    n2 = norm(x1)
    hfc = jnp.dot(n2, w_fc, preferred_element_type=jnp.float32) + b_fc
    hfc = 0.5 * hfc * (1.0 + jax.lax.erf(hfc * INV_SQRT2))   # exact GELU
    m = jnp.dot(hfc, wmp_ref[...], preferred_element_type=jnp.float32) + b_mp
    o_ref[...] = x1 + m                                   # residual 2


# ---------------- host-side one-time parameter packing ----------------
def prepare_params(params):
    """Fold LN affines / 1/sqrt(HD) / Wattp into weights and pack one slab."""
    (ln1w, ln1b, wqkv, bqkv, wattp, battp,
     ln2w, ln2b, wfc, bfc, wmp, bmp) = params
    scale = 1.0 / math.sqrt(HD)

    wq = wqkv[:, 0:C];  wk = wqkv[:, C:2 * C];  wv = wqkv[:, 2 * C:3 * C]
    bq = bqkv[:, 0:C];  bk = bqkv[:, C:2 * C];  bv = bqkv[:, 2 * C:3 * C]

    # fold LN1 affine:  (n*w1 + b1) @ W + b  ==  n @ (diag(w1) W) + (b1 W + b)
    d1 = ln1w[0][:, None]
    wq_f = wq * d1 * scale
    bq_f = (bq + ln1b @ wq) * scale
    wk_f = wk * d1
    bk_f = bk + ln1b @ wk
    wv_f = wv * d1
    bv_f = bv + ln1b @ wv

    # fold the attention output projection into Wv (per head) and the biases
    wvp = jnp.concatenate(
        [wv_f[:, h * HD:(h + 1) * HD] @ wattp[h * HD:(h + 1) * HD, :]
         for h in range(N_HEAD)], axis=1)                 # (C, N_HEAD*C)
    b_att = bv_f @ wattp + battp                          # (1, C)

    # fold LN2 affine into the first MLP layer
    d2 = ln2w[0][:, None]
    wfc_f = wfc * d2
    bfc_f = bfc + ln2b @ wfc

    # constants: additive block-diag causal mask + q head-select mask
    r_idx = jnp.arange(R)
    head_r = r_idx // BT
    bt_r = r_idx % BT
    batch_r = bt_r // T
    pos_r = bt_r % T
    allowed = ((head_r[:, None] == head_r[None, :])
               & (batch_r[:, None] == batch_r[None, :])
               & (pos_r[:, None] >= pos_r[None, :]))
    mask_bias = jnp.where(allowed, 0.0, -1e30).astype(jnp.float32)   # (64,64)
    q_sel = (head_r[:, None] == (jnp.arange(C)[None, :] // HD)
             ).astype(jnp.float32)                                   # (64,32)

    slab = jnp.zeros((SLAB_ROWS, SLAB_COLS), jnp.float32)
    slab = slab.at[0:C, COL_FC:COL_FC + 4 * C].set(wfc_f)
    slab = slab.at[0:C, COL_VP:COL_VP + N_HEAD * C].set(wvp)
    slab = slab.at[0:C, COL_Q:COL_Q + C].set(wq_f)
    slab = slab.at[0:C, COL_K:COL_K + C].set(wk_f)
    slab = slab.at[BIAS_ROW, COL_FC:COL_FC + 4 * C].set(bfc_f[0])
    slab = slab.at[BIAS_ROW, COL_BATT:COL_BATT + C].set(b_att[0])
    slab = slab.at[BIAS_ROW, COL_BMP:COL_BMP + C].set(bmp[0])
    slab = slab.at[BIAS_ROW, COL_Q:COL_Q + C].set(bq_f[0])
    slab = slab.at[BIAS_ROW, COL_K:COL_K + C].set(bk_f[0])
    slab = slab.at[MASK_ROW:MASK_ROW + R, 0:R].set(mask_bias)
    slab = slab.at[MASK_ROW:MASK_ROW + R, COL_QSEL:COL_QSEL + C].set(q_sel)
    return slab, wmp


# ---------------- wrapper ----------------
def transformer_block(x, slab, wmp):
    # Fold batch into the sublane (row) dim: (B, T, C) -> (B*T, C).
    x2 = x.reshape(BT, C)

    def full(shape):
        return pl.BlockSpec(shape, lambda i, n=len(shape): (0,) * n)

    out = pl.pallas_call(
        block_kernel,
        out_shape=jax.ShapeDtypeStruct((BT, C), jnp.float32),
        grid_spec=pltpu.PrefetchScalarGridSpec(
            num_scalar_prefetch=0,
            grid=(1,),                      # single fused invocation
            in_specs=[full(x2.shape), full(slab.shape), full(wmp.shape)],
            out_specs=full((BT, C)),
        ),
        compiler_params=pltpu.CompilerParams(
            dimension_semantics=("arbitrary",)),
    )(x2, slab, wmp)
    return out.reshape(B, T, C)


# ---------------- pure-JAX reference (for correctness check) ----------------
def reference_block(x, params):
    (ln1w, ln1b, wqkv, bqkv, wattp, battp,
     ln2w, ln2b, wfc, bfc, wmp, bmp) = params

    def ln(h, w, b):
        mu = jnp.mean(h, axis=-1, keepdims=True)
        var = jnp.mean((h - mu) ** 2, axis=-1, keepdims=True)
        return (h - mu) / jnp.sqrt(var + LN_EPS) * w[0] + b[0]

    h = ln(x, ln1w, ln1b)
    qkv = h @ wqkv + bqkv[0]
    q, k, v = jnp.split(qkv, 3, axis=-1)
    q = q.reshape(B, T, N_HEAD, HD).transpose(0, 2, 1, 3)
    k = k.reshape(B, T, N_HEAD, HD).transpose(0, 2, 1, 3)
    v = v.reshape(B, T, N_HEAD, HD).transpose(0, 2, 1, 3)
    att = jnp.einsum("bhqd,bhkd->bhqk", q, k) / math.sqrt(HD)
    mask = jnp.tril(jnp.ones((T, T), bool))
    att = jnp.where(mask, att, -1e30)
    att = jax.nn.softmax(att, axis=-1)
    y = jnp.einsum("bhqk,bhkd->bhqd", att, v).transpose(0, 2, 1, 3).reshape(B, T, C)
    x1 = x + (y @ wattp + battp[0])
    h2 = ln(x1, ln2w, ln2b)
    hfc = h2 @ wfc + bfc[0]
    hfc = 0.5 * hfc * (1.0 + jax.lax.erf(hfc / math.sqrt(2.0)))
    return x1 + (hfc @ wmp + bmp[0])


def init_params(key):
    ks = jax.random.split(key, 8)
    w = lambda k, shape: (0.02 * jax.random.normal(k, shape)).astype(jnp.float32)
    ln1w = jnp.ones((1, C), jnp.float32); ln1b = jnp.zeros((1, C), jnp.float32)
    ln2w = jnp.ones((1, C), jnp.float32); ln2b = jnp.zeros((1, C), jnp.float32)
    wqkv = w(ks[0], (C, 3 * C)); bqkv = w(ks[1], (1, 3 * C))
    wattp = w(ks[2], (C, C));    battp = w(ks[3], (1, C))
    wfc = w(ks[4], (C, 4 * C));  bfc = w(ks[5], (1, 4 * C))
    wmp = w(ks[6], (4 * C, C));  bmp = w(ks[7], (1, C))
    return (ln1w, ln1b, wqkv, bqkv, wattp, battp, ln2w, ln2b, wfc, bfc, wmp, bmp)


if __name__ == "__main__":
    key = jax.random.PRNGKey(0)
    kx, kp = jax.random.split(key)
    x = jax.random.normal(kx, (B, T, C), dtype=jnp.float32)
    params = init_params(kp)
    slab, wmp = prepare_params(params)     # one-time weight fold + packing

    out = transformer_block(x, slab, wmp)
    out = jax.block_until_ready(out)

    ref = reference_block(x, params)
    assert out.shape == (B, T, C)
    assert jnp.allclose(out, ref, atol=1e-3, rtol=1e-3), \
        f"max abs diff {jnp.max(jnp.abs(out - ref))}"
    print("KERNEL_OK")
</pallas_src>

<mosaic_0001>
module attributes {stable_mosaic.version = 11 : i64} {
  func.func @block_kernel(%arg0: i32, %arg1: memref<16x32xf32, #tpu.memory_space<vmem>>, %arg2: memref<104x320xf32, #tpu.memory_space<vmem>>, %arg3: memref<128x32xf32, #tpu.memory_space<vmem>>, %arg4: memref<16x32xf32, #tpu.memory_space<vmem>>) attributes {dimension_semantics = [#tpu.dimension_semantics<arbitrary>], iteration_bounds = array<i64: 1>, scalar_prefetch = 0 : i64, scratch_operands = 0 : i64, tpu.core_type = #tpu.core_type<tc>, window_params = [{pipeline_mode = #tpu.pipeline_mode<synchronous>, transform_indices = @transform_0, window_bounds = array<i64: 16, 32>}, {pipeline_mode = #tpu.pipeline_mode<synchronous>, transform_indices = @transform_1, window_bounds = array<i64: 104, 320>}, {pipeline_mode = #tpu.pipeline_mode<synchronous>, transform_indices = @transform_2, window_bounds = array<i64: 128, 32>}, {pipeline_mode = #tpu.pipeline_mode<synchronous>, transform_indices = @transform_3, window_bounds = array<i64: 16, 32>}]} {
    %c0 = arith.constant 0 : index
    %c0_0 = arith.constant 0 : index
    %0 = vector.load %arg1[%c0, %c0_0] : memref<16x32xf32, #tpu.memory_space<vmem>>, vector<16x32xf32>
    %c0_1 = arith.constant 0 : index
    %c0_2 = arith.constant 0 : index
    %1 = vector.load %arg2[%c0_1, %c0_2] : memref<104x320xf32, #tpu.memory_space<vmem>>, vector<32x128xf32>
    %c0_3 = arith.constant 0 : index
    %c128 = arith.constant 128 : index
    %2 = vector.load %arg2[%c0_3, %c128] : memref<104x320xf32, #tpu.memory_space<vmem>>, vector<32x192xf32>
    %c32 = arith.constant 32 : index
    %c0_4 = arith.constant 0 : index
    %3 = vector.load %arg2[%c32, %c0_4] : memref<104x320xf32, #tpu.memory_space<vmem>>, vector<1x128xf32>
    %c32_5 = arith.constant 32 : index
    %c128_6 = arith.constant 128 : index
    %4 = vector.load %arg2[%c32_5, %c128_6] : memref<104x320xf32, #tpu.memory_space<vmem>>, vector<1x32xf32>
    %c32_7 = arith.constant 32 : index
    %c160 = arith.constant 160 : index
    %5 = vector.load %arg2[%c32_7, %c160] : memref<104x320xf32, #tpu.memory_space<vmem>>, vector<1x32xf32>
    %c32_8 = arith.constant 32 : index
    %c256 = arith.constant 256 : index
    %6 = vector.load %arg2[%c32_8, %c256] : memref<104x320xf32, #tpu.memory_space<vmem>>, vector<1x32xf32>
    %c32_9 = arith.constant 32 : index
    %c288 = arith.constant 288 : index
    %7 = vector.load %arg2[%c32_9, %c288] : memref<104x320xf32, #tpu.memory_space<vmem>>, vector<1x32xf32>
    %c40 = arith.constant 40 : index
    %c0_10 = arith.constant 0 : index
    %8 = vector.load %arg2[%c40, %c0_10] : memref<104x320xf32, #tpu.memory_space<vmem>>, vector<64x64xf32>
    %c40_11 = arith.constant 40 : index
    %c128_12 = arith.constant 128 : index
    %9 = vector.load %arg2[%c40_11, %c128_12] : memref<104x320xf32, #tpu.memory_space<vmem>>, vector<64x32xf32>
    %cst = arith.constant dense<0.000000e+00> : vector<16xf32>
    %10 = vector.multi_reduction <add>, %0, %cst [1] : vector<16x32xf32> to vector<16xf32>
    %11 = vector.shape_cast %10 : vector<16xf32> to vector<16x1xf32>
    %cst_13 = arith.constant 3.200000e+01 : f32
    %12 = vector.broadcast %cst_13 : f32 to vector<16x1xf32>
    %13 = arith.divf %11, %12 : vector<16x1xf32>
    %14 = vector.broadcast %13 : vector<16x1xf32> to vector<16x32xf32>
    %15 = arith.subf %0, %14 : vector<16x32xf32>
    %16 = arith.mulf %15, %15 : vector<16x32xf32>
    %cst_14 = arith.constant dense<0.000000e+00> : vector<16xf32>
    %17 = vector.multi_reduction <add>, %16, %cst_14 [1] : vector<16x32xf32> to vector<16xf32>
    %18 = vector.shape_cast %17 : vector<16xf32> to vector<16x1xf32>
    %cst_15 = arith.constant 3.200000e+01 : f32
    %19 = vector.broadcast %cst_15 : f32 to vector<16x1xf32>
    %20 = arith.divf %18, %19 : vector<16x1xf32>
    %cst_16 = arith.constant 9.99999974E-6 : f32
    %21 = vector.broadcast %cst_16 : f32 to vector<16x1xf32>
    %22 = arith.addf %20, %21 : vector<16x1xf32>
    %23 = math.rsqrt %22 : vector<16x1xf32>
    %24 = vector.broadcast %23 : vector<16x1xf32> to vector<16x32xf32>
    %25 = arith.mulf %15, %24 : vector<16x32xf32>
    %cst_17 = arith.constant dense<0.000000e+00> : vector<16x192xf32>
    %26 = tpu.matmul %25, %2, %cst_17 {dimension_numbers = #tpu.dot_dimension_numbers<[1], [0], [0], [1], [0, 0, 1, 1], [], []>} : vector<16x32xf32>, vector<32x192xf32>, vector<16x192xf32> -> vector<16x192xf32>
    %27 = vector.extract_strided_slice %26 {offsets = [0, 0], sizes = [16, 128], strides = [1, 1]} : vector<16x192xf32> to vector<16x128xf32>
    %28 = vector.extract_strided_slice %26 {offsets = [0, 128], sizes = [16, 32], strides = [1, 1]} : vector<16x192xf32> to vector<16x32xf32>
    %29 = vector.broadcast %6 : vector<1x32xf32> to vector<16x32xf32>
    %30 = arith.addf %28, %29 : vector<16x32xf32>
    %31 = vector.extract_strided_slice %26 {offsets = [0, 160], sizes = [16, 32], strides = [1, 1]} : vector<16x192xf32> to vector<16x32xf32>
    %32 = vector.broadcast %7 : vector<1x32xf32> to vector<16x32xf32>
    %33 = arith.addf %31, %32 : vector<16x32xf32>
    %34 = tpu.concatenate %30, %30, %30, %30 in 0 : vector<16x32xf32>, vector<16x32xf32>, vector<16x32xf32>, vector<16x32xf32> -> vector<64x32xf32>
    %35 = arith.mulf %34, %9 : vector<64x32xf32>
    %36 = tpu.concatenate %33, %33, %33, %33 in 0 : vector<16x32xf32>, vector<16x32xf32>, vector<16x32xf32>, vector<16x32xf32> -> vector<64x32xf32>
    %cst_18 = arith.constant dense<0.000000e+00> : vector<64x64xf32>
    %37 = tpu.matmul %35, %36, %cst_18 {dimension_numbers = #tpu.dot_dimension_numbers<[1], [1], [0], [0], [0, 0, 1, 0], [], []>} : vector<64x32xf32>, vector<64x32xf32>, vector<64x64xf32> -> vector<64x64xf32>
    %38 = arith.addf %37, %8 : vector<64x64xf32>
    %cst_19 = arith.constant dense<0xFF800000> : vector<64xf32>
    %39 = vector.multi_reduction <maximumf>, %38, %cst_19 [1] : vector<64x64xf32> to vector<64xf32>
    %40 = vector.shape_cast %39 : vector<64xf32> to vector<64x1xf32>
    %41 = vector.broadcast %40 : vector<64x1xf32> to vector<64x64xf32>
    %42 = arith.subf %38, %41 : vector<64x64xf32>
    %43 = math.exp %42 : vector<64x64xf32>
    %cst_20 = arith.constant dense<0.000000e+00> : vector<64xf32>
    %44 = vector.multi_reduction <add>, %43, %cst_20 [1] : vector<64x64xf32> to vector<64xf32>
    %45 = vector.shape_cast %44 : vector<64xf32> to vector<64x1xf32>
    %46 = tpu.reciprocal %45 : vector<64x1xf32> -> vector<64x1xf32>
    %47 = vector.broadcast %46 : vector<64x1xf32> to vector<64x64xf32>
    %48 = arith.mulf %43, %47 : vector<64x64xf32>
    %49 = vector.extract_strided_slice %27 {offsets = [0, 0], sizes = [16, 32], strides = [1, 1]} : vector<16x128xf32> to vector<16x32xf32>
    %50 = vector.extract_strided_slice %27 {offsets = [0, 32], sizes = [16, 32], strides = [1, 1]} : vector<16x128xf32> to vector<16x32xf32>
    %51 = vector.extract_strided_slice %27 {offsets = [0, 64], sizes = [16, 32], strides = [1, 1]} : vector<16x128xf32> to vector<16x32xf32>
    %52 = vector.extract_strided_slice %27 {offsets = [0, 96], sizes = [16, 32], strides = [1, 1]} : vector<16x128xf32> to vector<16x32xf32>
    %53 = tpu.concatenate %49, %50, %51, %52 in 0 : vector<16x32xf32>, vector<16x32xf32>, vector<16x32xf32>, vector<16x32xf32> -> vector<64x32xf32>
    %cst_21 = arith.constant dense<0.000000e+00> : vector<64x32xf32>
    %54 = tpu.matmul %48, %53, %cst_21 {dimension_numbers = #tpu.dot_dimension_numbers<[1], [0], [0], [1], [0, 0, 1, 1], [], []>} : vector<64x64xf32>, vector<64x32xf32>, vector<64x32xf32> -> vector<64x32xf32>
    %55 = vector.extract_strided_slice %54 {offsets = [0, 0], sizes = [16, 32], strides = [1, 1]} : vector<64x32xf32> to vector<16x32xf32>
    %56 = vector.extract_strided_slice %54 {offsets = [16, 0], sizes = [16, 32], strides = [1, 1]} : vector<64x32xf32> to vector<16x32xf32>
    %57 = arith.addf %55, %56 : vector<16x32xf32>
    %58 = vector.extract_strided_slice %54 {offsets = [32, 0], sizes = [16, 32], strides = [1, 1]} : vector<64x32xf32> to vector<16x32xf32>
    %59 = arith.addf %57, %58 : vector<16x32xf32>
    %60 = vector.extract_strided_slice %54 {offsets = [48, 0], sizes = [16, 32], strides = [1, 1]} : vector<64x32xf32> to vector<16x32xf32>
    %61 = arith.addf %59, %60 : vector<16x32xf32>
    %62 = vector.broadcast %4 : vector<1x32xf32> to vector<16x32xf32>
    %63 = arith.addf %61, %62 : vector<16x32xf32>
    %64 = arith.addf %0, %63 : vector<16x32xf32>
    %cst_22 = arith.constant dense<0.000000e+00> : vector<16xf32>
    %65 = vector.multi_reduction <add>, %64, %cst_22 [1] : vector<16x32xf32> to vector<16xf32>
    %66 = vector.shape_cast %65 : vector<16xf32> to vector<16x1xf32>
    %cst_23 = arith.constant 3.200000e+01 : f32
    %67 = vector.broadcast %cst_23 : f32 to vector<16x1xf32>
    %68 = arith.divf %66, %67 : vector<16x1xf32>
    %69 = vector.broadcast %68 : vector<16x1xf32> to vector<16x32xf32>
    %70 = arith.subf %64, %69 : vector<16x32xf32>
    %71 = arith.mulf %70, %70 : vector<16x32xf32>
    %cst_24 = arith.constant dense<0.000000e+00> : vector<16xf32>
    %72 = vector.multi_reduction <add>, %71, %cst_24 [1] : vector<16x32xf32> to vector<16xf32>
    %73 = vector.shape_cast %72 : vector<16xf32> to vector<16x1xf32>
    %cst_25 = arith.constant 3.200000e+01 : f32
    %74 = vector.broadcast %cst_25 : f32 to vector<16x1xf32>
    %75 = arith.divf %73, %74 : vector<16x1xf32>
    %cst_26 = arith.constant 9.99999974E-6 : f32
    %76 = vector.broadcast %cst_26 : f32 to vector<16x1xf32>
    %77 = arith.addf %75, %76 : vector<16x1xf32>
    %78 = math.rsqrt %77 : vector<16x1xf32>
    %79 = vector.broadcast %78 : vector<16x1xf32> to vector<16x32xf32>
    %80 = arith.mulf %70, %79 : vector<16x32xf32>
    %cst_27 = arith.constant dense<0.000000e+00> : vector<16x128xf32>
    %81 = tpu.matmul %80, %1, %cst_27 {dimension_numbers = #tpu.dot_dimension_numbers<[1], [0], [0], [1], [0, 0, 1, 1], [], []>} : vector<16x32xf32>, vector<32x128xf32>, vector<16x128xf32> -> vector<16x128xf32>
    %82 = vector.broadcast %3 : vector<1x128xf32> to vector<16x128xf32>
    %83 = arith.addf %81, %82 : vector<16x128xf32>
    %cst_28 = arith.constant 5.000000e-01 : f32
    %84 = vector.broadcast %cst_28 : f32 to vector<16x128xf32>
    %85 = arith.mulf %84, %83 : vector<16x128xf32>
    %cst_29 = arith.constant 0.707106769 : f32
    %86 = vector.broadcast %cst_29 : f32 to vector<16x128xf32>
    %87 = arith.mulf %83, %86 : vector<16x128xf32>
    %88 = math.erf %87 : vector<16x128xf32>
    %cst_30 = arith.constant 1.000000e+00 : f32
    %89 = vector.broadcast %cst_30 : f32 to vector<16x128xf32>
    %90 = arith.addf %89, %88 : vector<16x128xf32>
    %91 = arith.mulf %85, %90 : vector<16x128xf32>
    %c0_31 = arith.constant 0 : index
    %c0_32 = arith.constant 0 : index
    %92 = vector.load %arg3[%c0_31, %c0_32] : memref<128x32xf32, #tpu.memory_space<vmem>>, vector<128x32xf32>
    %cst_33 = arith.constant dense<0.000000e+00> : vector<16x32xf32>
    %93 = tpu.matmul %91, %92, %cst_33 {dimension_numbers = #tpu.dot_dimension_numbers<[1], [0], [0], [1], [0, 0, 1, 1], [], []>} : vector<16x128xf32>, vector<128x32xf32>, vector<16x32xf32> -> vector<16x32xf32>
    %94 = vector.broadcast %5 : vector<1x32xf32> to vector<16x32xf32>
    %95 = arith.addf %93, %94 : vector<16x32xf32>
    %96 = arith.addf %64, %95 : vector<16x32xf32>
    %c0_34 = arith.constant 0 : index
    %c0_35 = arith.constant 0 : index
    %97 = vector.load %arg4[%c0_34, %c0_35] : memref<16x32xf32, #tpu.memory_space<vmem>>, vector<16x32xf32>
    tpu.vector_store %arg4[%c0_34, %c0_35], %96 {strides = array<i32>} : memref<16x32xf32, #tpu.memory_space<vmem>>, vector<16x32xf32>,
    return
  }
  func.func @transform_0(%arg0: i32) -> (i32, i32) {
    %c0_i32 = arith.constant 0 : i32
    %c0_i32_0 = arith.constant 0 : i32
    %c0_i32_1 = arith.constant 0 : i32
    return %c0_i32, %c0_i32_0 : i32, i32
  }
  func.func @transform_1(%arg0: i32) -> (i32, i32) {
    %c0_i32 = arith.constant 0 : i32
    %c0_i32_0 = arith.constant 0 : i32
    %c0_i32_1 = arith.constant 0 : i32
    return %c0_i32, %c0_i32_0 : i32, i32
  }
  func.func @transform_2(%arg0: i32) -> (i32, i32) {
    %c0_i32 = arith.constant 0 : i32
    %c0_i32_0 = arith.constant 0 : i32
    %c0_i32_1 = arith.constant 0 : i32
    return %c0_i32, %c0_i32_0 : i32, i32
  }
  func.func @transform_3(%arg0: i32) -> (i32, i32) {
    %c0_i32 = arith.constant 0 : i32
    %c0_i32_0 = arith.constant 0 : i32
    %c0_i32_1 = arith.constant 0 : i32
    return %c0_i32, %c0_i32_0 : i32, i32
  }
}

</mosaic_0001>

<bundles_post_ra>
// kernel: tpu_custom_call.1
= control target key start
LH: loop header
LB: loop body
LE: loop exit
PB: predicated region body
PF: predicated region fallthrough
CT: control target
= control target key end

     0   :  { %8 = vsyncpa [#allocation3], 0  ;;  %s1413_s0 = inlined_call_operand.vmem [shape: f32[16,32], index: 0, kind: input, shape index: {}]   ;;  %s1414_s1 = inlined_call_operand.hbm [shape: f32[104,320], index: 1, kind: input, shape index: {}]   ;;  %s1415_s2 = inlined_call_operand.vmem [shape: f32[128,32], index: 2, kind: input, shape index: {}]   ;;  %s1416_s3 = inlined_call_operand.hbm [shape: f32[16,32], index: 3, kind: output, shape index: {}]  }
   0x1   :  { %9 = vsyncpa [#allocation4], 0  ;;  %s1205_s12 = smov [#allocation2]   ;;  %s1157_s16 = scalar_lea.hbm %s1414_s1, 4992 }
   0x2   :  { %s17_s13 = sshll.u32 %s1205_s12, 4  ;;  %p1158_p0 = scmp.ne.s32.totalorder %s1414_s1, %s1157_s16  ;;  %s18_s13 = int_to_ptr.vmem [resolvable:$true] %s17_s13 }
   0x3   :  { %p1161_p1 = scmp.lt.u32.totalorder %s1157_s16, %s1414_s1 }
   0x5   :  { %p1163_p2 = pnand %p1161_p1, %p1158_p0 }
   0x7   :  { %1166 = shalt.err (!%p1163_p2)
}
   0x8   :  { %s1167_s21 = scalar_lea.vmem %s18_s13, 4992  ;;  %p1172_p4 = scmp.lt.s32.totalorder %s18_s13, %s18_s13 }
   0x9   :  { %p1168_p3 = scmp.ne.s32.totalorder %s18_s13, %s1167_s21  ;;  %p1173_p5 = scmp.lt.s32.totalorder %s1167_s21, %s1167_s21 }
   0xb   :  { %p1174_p6 = por %p1173_p5, %p1172_p4 }
   0xd   :  { %p1175_p7 = pnand %p1174_p6, %p1168_p3 }
   0xf   :  { %1178 = shalt.err (!%p1175_p7)
}
  0x10   :  { %s1206_s22 = smov 384   ;;  %s1207_s23 = smov 24  }
  0x11   :  { %23 = dma.hbm_to_vmem [thread:$0]  %s1414_s1, 4992, %s18_s13, [#allocation3], %s1206_s22, %s1206_s22, %s1207_s23  }
  0x12   :  { %1201 = dma.done.wait [#allocation3], 4992  }
  0x13   :  { %1202 = vsyncadd [#allocation3], 4294962304  ;;  %vm62_vm0 = vcmask 261120   ;;  %v1250_v0 = vld [vmem:[%s1413_s0] sm:$0xff]  ;;  %v1255_v1 = vld [vmem:[%s1413_s0 + $0x8] sm:$0xff]  ;;  %v1208_v25 = vmov 0.0  }
  0x14   :  { %v63_v2 = vsel %vm62_vm0, %v1250_v0, 0.0  ;;  %v66_v3 = vsel %vm62_vm0, %v1255_v1, 0.0  ;;  %v36_v14 = vld [vmem:[#allocation2 + $0x10] sm:$0xff]  ;;  %v38_v15 = vld [vmem:[#allocation2 + $0x28] sm:$0xff]  ;;  %v37_v18 = vld [vmem:[#allocation2 + $0x20] sm:$0xff]  ;;  %160 = vmatprep.mubr.f32.mxu0 %v1208_v25  ;;  %s1209_s0 = smov 96  }
  0x15   :  { %64 = vadd.xlane.f32.xlu0 %v63_v2  ;;  %v989_v16 = vpack.c.bf16 %v38_v15, %v36_v14  ;;  %v35_v17 = vld [vmem:[#allocation2 + $0x8] sm:$0xff]  ;;  %v40_v20 = vld [vmem:[#allocation2 + $0x40] sm:$0xff]  ;;  %v42_v21 = vld [vmem:[#allocation2 + $0x58] sm:$0xff]  ;;  %vm322_vm2 = vcmask 523264   ;;  %s1210_s1 = smov 32   ;;  %s1211_s30 = smov 64  }
  0x16   :  { %v991_v19 = vpack.c.bf16 %v37_v18, %v35_v17  ;;  %v39_v22 = vld [vmem:[#allocation2 + $0x38] sm:$0xff]  ;;  %v993_v23 = vpack.c.bf16 %v42_v21, %v40_v20  ;;  %v41_v24 = vld [vmem:[#allocation2 + $0x50] sm:$0xff]  ;;  %v54_v40 = vld [vmem:[#allocation2 + $0x80] sm:$0xff] }
  0x17   :  { %990 = vmatprep.subr.bf16.mxu0 %v989_v16  ;;  %v995_v26 = vpack.c.bf16 %v41_v24, %v39_v22  ;;  %v45_v37 = vld [vmem:[#allocation2 + $0x70] ss:$0 sm:$0xff]  ;;  %vm998_vm1 = vmpackc.low %vm62_vm0, %vm62_vm0  ;;  %v55_v53 = vld [vmem:[#allocation2 + $0x98] sm:$0xff] }
  0x18   :  { %992 = vmatpush1.bf16.msra.mxu0 %v991_v19  ;;  %v56_v54 = vld [vmem:[#allocation2 + $0xb0] sm:$0xff]  ;;  %v57_v57 = vld [vmem:[#allocation2 + $0xc8] sm:$0xff]  ;;  %v58_v58 = vld [vmem:[#allocation2 + $0xe0] sm:$0xff] }
  0x19   :  { %67 = vadd.xlane.f32.xlu0 %v66_v3  ;;  %994 = vmatprep.subr.bf16.mxu0 %v993_v23  ;;  %v59_v61 = vld [vmem:[#allocation2 + $0xf8] sm:$0xff]  ;;  %v60_v62 = vld [vmem:[#allocation2 + $0x110] sm:$0xff]  ;;  %v61_v3 = vld [vmem:[#allocation2 + $0x128] sm:$0xff] }
  0x1a   :  { %v48_v17 = vld [vmem:[#allocation2 + $0xa8] sm:$0xff]  ;;  %v51_v23 = vld [vmem:[#allocation2 + $0xf0] sm:$0xff] }
  0x1b   :  { %v52_v22 = vld [vmem:[#allocation2 + $0x108] sm:$0xff] }
  0x1c   :  { %996 = vmatpush1.bf16.msra.mxu0 %v995_v26 }
  0xa2   :  { %v65_v4 = vpop.xlane.xlu0 %64 }
  0xa3   :  { %v70_v5 = vmul.f32 0.03125, %v65_v4 }
  0xa5   :  { %v72_v6 = vsub.f32 %v1250_v0, %v70_v5  ;;  %v47_v5 = vld [vmem:[#allocation2 + $0x90] sm:$0xff] }
  0xa6   :  { %v68_v7 = vpop.xlane.xlu0 %67 }
  0xa7   :  { %v71_v8 = vmul.f32 0.03125, %v68_v7  ;;  %v74_v9 = vmul.f32 %v72_v6, %v72_v6  ;;  %v46_v7 = vld [vmem:[#allocation2 + $0x78] sm:$0xff] }
  0xa9   :  { %v73_v10 = vsub.f32 %v1255_v1, %v71_v8  ;;  %v76_v11 = vsel %vm62_vm0, %v74_v9, 0.0 }
  0xaa   :  { %77 = vadd.xlane.f32.xlu1 %v76_v11 }
  0xab   :  { %v75_v12 = vmul.f32 %v73_v10, %v73_v10 }
  0xad   :  { %v79_v13 = vsel %vm62_vm0, %v75_v12, 0.0  ;;  %v49_v12 = vld [vmem:[#allocation2 + $0xc0] sm:$0xff] }
  0xae   :  { %80 = vadd.xlane.f32.xlu1 %v79_v13 }
 0x137   :  { %v78_v27 = vpop.xlane.xlu1 %77 }
 0x138   :  { %v82_v28 = vmul.f32 0.03125, %v78_v27 }
 0x13a   :  { %v84_v29 = vadd.f32 1e-05, %v82_v28 }
 0x13b   :  { %v81_v30 = vpop.xlane.xlu1 %80 }
 0x13c   :  { %1113 = vrsqrt.f32 %v84_v29  ;;  %v83_v31 = vmul.f32 0.03125, %v81_v30  ;;  %v50_v29 = vld [vmem:[#allocation2 + $0xd8] sm:$0xff] }
 0x13e   :  { %v85_v32 = vadd.f32 1e-05, %v83_v31 }
 0x140   :  { %1115 = vrsqrt.f32 %v85_v32 }
 0x146   :  { %v1114_v33 = vpop.eup %1113 }
 0x147   :  { %v88_v34 = vmul.f32 %v1114_v33, %v72_v6  ;;  %v53_v33 = vld [vmem:[#allocation2 + $0x120] sm:$0xff] }
 0x149   :  { %803 = vmatmul.mubr.msk.f32.vlgmr.msra.gmra.mrb[0].mxu0 %vm62_vm0, %v88_v34 }
 0x14a   :  { %v1116_v35 = vpop.eup %1115  ;;  %166 = vmatprep.mubr.f32.mxu0 %v1208_v25 }
 0x14b   :  { %v89_v36 = vmul.f32 %v1116_v35, %v73_v10 }
 0x14d   :  { %804 = vmatmul.mubr.msk.f32.gmra.mrb[2].mxu0 %vm62_vm0, %v89_v36 }
 0x21c   :  { %v162_v38 = vpop.f32.mrb[0].mxu0 }
 0x21d   :  { %v164_v39 = vpop.f32.mrb[1].mxu0 }
 0x21e   :  { %v173_v41 = vadd.f32 %v164_v39, %v45_v37 }
 0x220   :  { %v168_v42 = vpop.f32.mrb[2].mxu0  ;;  %v175_v43 = vmul.f32 %v173_v41, %v54_v40  ;;  %v177_v56 = vmul.f32 %v173_v41, %v56_v54  ;;  %v179_v60 = vmul.f32 %v173_v41, %v58_v58  ;;  %v181_v2 = vmul.f32 %v173_v41, %v60_v62 }
 0x221   :  { %v170_v44 = vpop.f32.mrb[3].mxu0  ;;  %v1021_v45 = vpack.c.bf16 %v168_v42, %v162_v38  ;;  %v1267_v46 = vpack.i.bf16 %v168_v42, %v162_v38 }
 0x222   :  { %v174_v47 = vadd.f32 %v170_v44, %v45_v37  ;;  %903 = vmatprep.mubr.msk.f32.mxu1 %vm62_vm0, %v175_v43 }
 0x223   :  { %1022 = vmatprep.subr.bf16.mxu0 %v1021_v45 }
 0x224   :  { %1024 = vmatpush3.bf16.msra.mxu0 %v1021_v45  ;;  %v1093_v48 = vpack.i.bf16 %v174_v47, %v173_v41  ;;  %v176_v55 = vmul.f32 %v174_v47, %v55_v53  ;;  %v178_v59 = vmul.f32 %v174_v47, %v57_v57  ;;  %v180_v63 = vmul.f32 %v174_v47, %v59_v61 }
 0x225   :  { %v182_v4 = vmul.f32 %v174_v47, %v61_v3 }
 0x226   :  { %1094 = vrot.lane.b32.xlu0 %v1093_v48, %s1209_s0 }
 0x298   :  { %v1095_v49 = vpop.permute.xlu0 %1094 }
 0x299   :  { %v1097_v50 = vunpack.i.h.bf16 %v1095_v49  ;;  %v1096_v51 = vunpack.i.l.bf16 %v1095_v49 }
 0x29b   :  { %v997_v52 = vpack.c.bf16 %v1097_v50, %v1096_v51 }
 0x29d   :  { %999 = vmatprep.subr.msk.bf16.mxu1 %vm998_vm1, %v997_v52 }
 0x29e   :  { %1002 = vmatpush3.bf16.xpose.msk.msra.mxu1 %vm998_vm1, %v997_v52 }
 0x29f   :  { %1005 = vmatprep.subr.msk.bf16.mxu1 %vm998_vm1, %v997_v52 }
 0x2a6   :  { %1008 = vmatpush3.bf16.xpose.msk.msra.mxu1 %vm998_vm1, %v997_v52 }
 0x2a7   :  { %1011 = vmatprep.subr.msk.bf16.mxu1 %vm998_vm1, %v997_v52 }
 0x2ae   :  { %1014 = vmatpush3.bf16.xpose.msk.msra.mxu1 %vm998_vm1, %v997_v52 }
 0x2af   :  { %1017 = vmatprep.subr.msk.bf16.mxu1 %vm998_vm1, %v997_v52 }
 0x2b6   :  { %1020 = vmatpush3.bf16.xpose.msk.msra.mxu1 %vm998_vm1, %v997_v52 }
 0x2bd   :  { %904 = vmatmul.mubr.msk.f32.vlgmr.msra.gmra.mrb[0].mxu1 %vm62_vm0, %v176_v55 }
 0x2be   :  { %906 = vmatprep.mubr.msk.f32.mxu1 %vm62_vm0, %v177_v56 }
 0x2c1   :  { %907 = vmatmul.mubr.msk.f32.gmra.mrb[2].mxu1 %vm62_vm0, %v178_v59 }
 0x2c2   :  { %909 = vmatprep.mubr.msk.f32.mxu1 %vm62_vm0, %v179_v60 }
 0x2c5   :  { %910 = vmatmul.mubr.msk.f32.gmra.mrb[4].mxu1 %vm62_vm0, %v180_v63 }
 0x2c6   :  { %912 = vmatprep.mubr.msk.f32.mxu1 %vm62_vm0, %v181_v2 }
 0x2c9   :  { %913 = vmatmul.mubr.msk.f32.gmra.mrb[6].mxu1 %vm62_vm0, %v182_v4 }
 0x390   :  { %v905_v6 = vpop.f32.mrb[0].mxu1 }
 0x391   :  { %v289_v8 = vadd.f32 %v905_v6, %v47_v5  ;;  %v283_v9 = vpop.f32.mrb[1].mxu1 }
 0x392   :  { %v284_v10 = vadd.f32 %v283_v9, %v46_v7 }
 0x393   :  { %v326_v11 = vsel %vm322_vm2, %v289_v8, -inf }
 0x394   :  { %327 = vmax.xlane.f32.xlu1 %v326_v11  ;;  %v908_v13 = vpop.f32.mrb[2].mxu1  ;;  %v323_v16 = vsel %vm322_vm2, %v284_v10, -inf }
 0x395   :  { %v293_v14 = vpop.f32.mrb[3].mxu1  ;;  %v299_v15 = vadd.f32 %v908_v13, %v49_v12 }
 0x396   :  { %v294_v20 = vadd.f32 %v293_v14, %v48_v17 }
 0x397   :  { %v332_v21 = vsel %vm322_vm2, %v299_v15, -inf }
 0x398   :  { %v911_v18 = vpop.f32.mrb[4].mxu1  ;;  %324 = vmax.xlane.f32.xlu1 %v323_v16  ;;  %v329_v28 = vsel %vm322_vm2, %v294_v20, -inf }
 0x399   :  { %v303_v19 = vpop.f32.mrb[5].mxu1  ;;  %v309_v27 = vadd.f32 %v911_v18, %v51_v23 }
 0x39a   :  { %v304_v31 = vadd.f32 %v303_v19, %v50_v29 }
 0x39b   :  { %v338_v32 = vsel %vm322_vm2, %v309_v27, -inf }
 0x39c   :  { %v914_v24 = vpop.f32.mrb[6].mxu1  ;;  %333 = vmax.xlane.f32.xlu1 %v332_v21  ;;  %v335_v35 = vsel %vm322_vm2, %v304_v31, -inf }
 0x39d   :  { %v313_v25 = vpop.f32.mrb[7].mxu1  ;;  %v1289_v34 = vadd.f32 %v914_v24, %v53_v33 }
 0x39e   :  { %v1283_v26 = vadd.f32 %v313_v25, %v52_v22 }
 0x39f   :  { %v344_v36 = vsel %vm322_vm2, %v1289_v34, -inf }
 0x3a0   :  { %330 = vmax.xlane.f32.xlu1 %v329_v28  ;;  %v341_v30 = vsel %vm322_vm2, %v1283_v26, -inf }
 0x3a1   :  { %342 = vmax.xlane.f32.xlu0 %v341_v30 }
 0x3a4   :  { %339 = vmax.xlane.f32.xlu1 %v338_v32 }
 0x3a8   :  { %336 = vmax.xlane.f32.xlu1 %v335_v35 }
 0x3ac   :  { %345 = vmax.xlane.f32.xlu1 %v344_v36 }
 0x3bd   :  { %1099 = vrot.lane.b32.xlu1 %v1267_v46, %s1209_s0 }
 0x421   :  { %v328_v37 = vpop.xlane.xlu1 %327 }
 0x422   :  { %v348_v38 = vsub.f32 %v289_v8, %v328_v37 }
 0x424   :  { %v357_v39 = vmul.f32 1.442695, %v348_v38 }
 0x425   :  { %v325_v40 = vpop.xlane.xlu1 %324 }
 0x426   :  { %1117 = vpow2.f32 %v357_v39  ;;  %v347_v41 = vsub.f32 %v284_v10, %v325_v40 }
 0x428   :  { %v355_v42 = vmul.f32 1.442695, %v347_v41 }
 0x429   :  { %v334_v43 = vpop.xlane.xlu1 %333 }
 0x42a   :  { %1119 = vpow2.f32 %v355_v42  ;;  %v350_v44 = vsub.f32 %v299_v15, %v334_v43 }
 0x42c   :  { %v361_v45 = vmul.f32 1.442695, %v350_v44 }
 0x42d   :  { %v331_v47 = vpop.xlane.xlu1 %330 }
 0x42e   :  { %1121 = vpow2.f32 %v361_v45  ;;  %v349_v48 = vsub.f32 %v294_v20, %v331_v47  ;;  %v343_v11 = vpop.xlane.xlu0 %342  ;;  %v44_v20 = vld [vmem:[#allocation2 + $0x68] ss:$0 sm:$0xff] }
 0x42f   :  { %v353_v12 = vsub.f32 %v1283_v26, %v343_v11  ;;  %v34_v11 = vld [vmem:[#allocation2 + $0x48] sm:$0xff] }
 0x430   :  { %v1296_v49 = vpop.eup %1117  ;;  %v359_v50 = vmul.f32 1.442695, %v349_v48 }
 0x431   :  { %v340_v51 = vpop.xlane.xlu1 %339  ;;  %v374_v52 = vsel %vm322_vm2, %v1296_v49, 0.0  ;;  %v367_v13 = vmul.f32 1.442695, %v353_v12 }
 0x432   :  { %1123 = vpow2.f32 %v359_v50  ;;  %v352_v53 = vsub.f32 %v309_v27, %v340_v51  ;;  %375 = vadd.xlane.f32.xlu1 %v374_v52 }
 0x434   :  { %v1120_v54 = vpop.eup %1119  ;;  %v365_v55 = vmul.f32 1.442695, %v352_v53 }
 0x435   :  { %v337_v56 = vpop.xlane.xlu1 %336  ;;  %v371_v57 = vsel %vm322_vm2, %v1120_v54, 0.0 }
 0x436   :  { %1125 = vpow2.f32 %v365_v55  ;;  %v351_v58 = vsub.f32 %v304_v31, %v337_v56  ;;  %372 = vadd.xlane.f32.xlu1 %v371_v57 }
 0x438   :  { %v1301_v59 = vpop.eup %1121  ;;  %v363_v60 = vmul.f32 1.442695, %v351_v58 }
 0x439   :  { %v346_v61 = vpop.xlane.xlu1 %345  ;;  %v380_v62 = vsel %vm322_vm2, %v1301_v59, 0.0 }
 0x43a   :  { %1127 = vpow2.f32 %v363_v60  ;;  %381 = vadd.xlane.f32.xlu1 %v380_v62  ;;  %v354_v14 = vsub.f32 %v1289_v34, %v346_v61  ;;  %v31_v61 = vld [vmem:[#allocation2] sm:$0xff]  ;;  %v32_v62 = vld [vmem:[#allocation2 + $0x18] sm:$0xff] }
 0x43b   :  { %1129 = vpow2.f32 %v367_v13  ;;  %v687_v13 = vld [vmem:[%s1415_s2] sm:$0xff] }
 0x43c   :  { %v1305_v63 = vpop.eup %1123  ;;  %v369_v15 = vmul.f32 1.442695, %v354_v14  ;;  %v688_v14 = vld [vmem:[%s1415_s2 + $0x8] sm:$0xff] }
 0x43d   :  { %v1100_v2 = vpop.permute.xlu1 %1099  ;;  %v377_v3 = vsel %vm322_vm2, %v1305_v63, 0.0 }
 0x43e   :  { %v1102_v4 = vunpack.i.h.bf16 %v1100_v2  ;;  %v1101_v5 = vunpack.i.l.bf16 %v1100_v2  ;;  %378 = vadd.xlane.f32.xlu1 %v377_v3  ;;  %1131 = vpow2.f32 %v369_v15  ;;  %v689_v15 = vld [vmem:[%s1415_s2 + $0x10] sm:$0xff] }
 0x440   :  { %v1309_v6 = vpop.eup %1125  ;;  %v1025_v7 = vpack.c.bf16 %v1102_v4, %v1101_v5 }
 0x441   :  { %v386_v8 = vsel %vm322_vm2, %v1309_v6, 0.0 }
 0x442   :  { %387 = vadd.xlane.f32.xlu0 %v386_v8  ;;  %1026 = vmatprep.subr.bf16.mxu0 %v1025_v7 }
 0x443   :  { %1028 = vmatpush3.bf16.msra.mxu0 %v1025_v7 }
 0x444   :  { %v1128_v9 = vpop.eup %1127 }
 0x445   :  { %v383_v10 = vsel %vm322_vm2, %v1128_v9, 0.0  ;;  %v1130_v16 = vpop.eup %1129 }
 0x446   :  { %384 = vadd.xlane.f32.xlu0 %v383_v10  ;;  %v389_v17 = vsel %vm322_vm2, %v1130_v16, 0.0  ;;  %v33_v10 = vld [vmem:[#allocation2 + $0x30] sm:$0xff] }
 0x447   :  { %v1041_v12 = vpack.c.bf16 %v34_v11, %v33_v10 }
 0x448   :  { %v1132_v18 = vpop.eup %1131 }
 0x449   :  { %v392_v19 = vsel %vm322_vm2, %v1132_v18, 0.0 }
 0x44f   :  { %1109 = vrot.lane.b32.xlu1 %v1267_v46, %s1210_s1 }
 0x45c   :  { %1104 = vrot.lane.b32.xlu0 %v1267_v46, %s1211_s30 }
 0x473   :  { %390 = vadd.xlane.f32.xlu1 %v389_v17  ;;  %v690_v17 = vld [vmem:[%s1415_s2 + $0x18] sm:$0xff] }
 0x47b   :  { %393 = vadd.xlane.f32.xlu0 %v392_v19  ;;  %v691_v19 = vld [vmem:[%s1415_s2 + $0x20] sm:$0xff] }
 0x491   :  { %704 = vrot.lane.b32.xlu0 %v44_v20, %s1209_s0 }
 0x4bf   :  { %v376_v46 = vpop.xlane.xlu1 %375 }
 0x4c3   :  { %v373_v21 = vpop.xlane.xlu1 %372 }
 0x4c4   :  { %1133 = vrcp.f32 %v373_v21 }
 0x4c5   :  { %1135 = vrcp.f32 %v376_v46 }
 0x4c7   :  { %v382_v22 = vpop.xlane.xlu1 %381 }
 0x4cb   :  { %v379_v24 = vpop.xlane.xlu1 %378 }
 0x4cc   :  { %1137 = vrcp.f32 %v379_v24 }
 0x4cd   :  { %1139 = vrcp.f32 %v382_v22 }
 0x4ce   :  { %v1134_v23 = vpop.eup %1133 }
 0x4cf   :  { %v388_v25 = vpop.xlane.xlu0 %387  ;;  %v403_v26 = vmul.f32 %v1134_v23, %v1120_v54  ;;  %v1110_v28 = vpop.permute.xlu1 %1109 }
 0x4d0   :  { %v1112_v30 = vunpack.i.h.bf16 %v1110_v28  ;;  %v1111_v31 = vunpack.i.l.bf16 %v1110_v28  ;;  %v1136_v36 = vpop.eup %1135 }
 0x4d1   :  { %931 = vmatprep.mubr.msk.f32.mxu0 %vm322_vm2, %v403_v26  ;;  %v404_v38 = vmul.f32 %v1136_v36, %v1296_v49 }
 0x4d2   :  { %v1033_v35 = vpack.c.bf16 %v1112_v30, %v1111_v31  ;;  %v693_v31 = vld [vmem:[%s1415_s2 + $0x30] sm:$0xff] }
 0x4d3   :  { %v385_v27 = vpop.xlane.xlu0 %384 }
 0x4d4   :  { %1141 = vrcp.f32 %v385_v27 }
 0x4d5   :  { %1143 = vrcp.f32 %v388_v25 }
 0x4d6   :  { %v1138_v37 = vpop.eup %1137 }
 0x4d7   :  { %v1105_v29 = vpop.permute.xlu0 %1104  ;;  %v405_v39 = vmul.f32 %v1138_v37, %v1305_v63  ;;  %v1140_v40 = vpop.eup %1139  ;;  %v1037_v63 = vpack.c.bf16 %v32_v62, %v31_v61  ;;  %v697_v37 = vld [vmem:[%s1415_s2 + $0x50] sm:$0xff] }
 0x4d8   :  { %v1107_v32 = vunpack.i.h.bf16 %v1105_v29  ;;  %v1106_v33 = vunpack.i.l.bf16 %v1105_v29  ;;  %v406_v42 = vmul.f32 %v1140_v40, %v1301_v59  ;;  %v699_v40 = vld [vmem:[%s1415_s2 + $0x60] sm:$0xff] }
 0x4da   :  { %v1029_v34 = vpack.c.bf16 %v1107_v32, %v1106_v33  ;;  %v694_v32 = vld [vmem:[%s1415_s2 + $0x38] sm:$0xff] }
 0x4db   :  { %v1057_v33 = vpack.c.bf16 %v694_v32, %v693_v31 }
 0x4dc   :  { %1030 = vmatprep.subr.bf16.mxu0 %v1029_v34 }
 0x4dd   :  { %1032 = vmatpush3.bf16.msra.mxu0 %v1029_v34  ;;  %v695_v34 = vld [vmem:[%s1415_s2 + $0x40] sm:$0xff] }
 0x4de   :  { %1034 = vmatprep.subr.bf16.mxu0 %v1033_v35  ;;  %v1142_v41 = vpop.eup %1141 }
 0x4df   :  { %v407_v43 = vmul.f32 %v1142_v41, %v1128_v9  ;;  %v1144_v44 = vpop.eup %1143  ;;  %v700_v41 = vld [vmem:[%s1415_s2 + $0x68] sm:$0xff] }
 0x4e0   :  { %v408_v45 = vmul.f32 %v1144_v44, %v1309_v6  ;;  %v702_v44 = vld [vmem:[%s1415_s2 + $0x78] sm:$0xff] }
 0x4e1   :  { %1036 = vmatpush3.bf16.msra.mxu0 %v1033_v35  ;;  %v696_v35 = vld [vmem:[%s1415_s2 + $0x48] sm:$0xff] }
 0x4e2   :  { %1038 = vmatprep.subr.bf16.mxu0 %v1037_v63  ;;  %v1061_v36 = vpack.c.bf16 %v696_v35, %v695_v34 }
 0x4e4   :  { %932 = vmatmul.mubr.msk.f32.vlgmr.msra.gmra.mrb[4].mxu0 %vm322_vm2, %v404_v38  ;;  %v698_v38 = vld [vmem:[%s1415_s2 + $0x58] sm:$0xff] }
 0x4e5   :  { %934 = vmatprep.mubr.msk.f32.mxu0 %vm322_vm2, %v405_v39  ;;  %1040 = vmatpush3.bf16.msra.mxu0 %v1037_v63  ;;  %v1065_v39 = vpack.c.bf16 %v698_v38, %v697_v37 }
 0x4e6   :  { %1042 = vmatprep.subr.bf16.mxu0 %v1041_v12 }
 0x4e9   :  { %1044 = vmatpush3.bf16.msra.mxu0 %v1041_v12 }
 0x4ec   :  { %935 = vmatmul.mubr.msk.f32.gmra.mrb[4].mxu0 %vm322_vm2, %v406_v42  ;;  %v1069_v42 = vpack.c.bf16 %v700_v41, %v699_v40 }
 0x4ed   :  { %937 = vmatprep.mubr.msk.f32.mxu0 %vm322_vm2, %v407_v43  ;;  %v701_v43 = vld [vmem:[%s1415_s2 + $0x70] sm:$0xff] }
 0x4f4   :  { %938 = vmatmul.mubr.msk.f32.gmra.mrb[4].mxu0 %vm322_vm2, %v408_v45  ;;  %v1073_v45 = vpack.c.bf16 %v702_v44, %v701_v43 }
 0x500   :  { %v391_v47 = vpop.xlane.xlu1 %390 }
 0x501   :  { %1145 = vrcp.f32 %v391_v47  ;;  %v43_v47 = vld [vmem:[#allocation2 + $0x60] ss:$0 sm:$0xff] }
 0x508   :  { %v394_v48 = vpop.xlane.xlu0 %393 }
 0x509   :  { %1147 = vrcp.f32 %v394_v48 }
 0x50b   :  { %v1146_v49 = vpop.eup %1145 }
 0x50c   :  { %v409_v50 = vmul.f32 %v1146_v49, %v1130_v16  ;;  %v1045_v16 = vpack.c.bf16 %v688_v14, %v687_v13 }
 0x50e   :  { %940 = vmatprep.mubr.msk.f32.mxu0 %vm322_vm2, %v409_v50  ;;  %1046 = vmatprep.subr.bf16.mxu1 %v1045_v16 }
 0x50f   :  { %1048 = vmatpush3.bf16.msra.mxu1 %v1045_v16 }
 0x513   :  { %v1148_v51 = vpop.eup %1147 }
 0x514   :  { %v410_v52 = vmul.f32 %v1148_v51, %v1132_v18  ;;  %v1049_v18 = vpack.c.bf16 %v690_v17, %v689_v15 }
 0x516   :  { %941 = vmatmul.mubr.msk.f32.gmra.mrb[4].mxu0 %vm322_vm2, %v410_v52  ;;  %1050 = vmatprep.subr.bf16.mxu1 %v1049_v18 }
 0x517   :  { %1052 = vmatpush3.bf16.msra.mxu1 %v1049_v18 }
 0x5e9   :  { %v942_v53 = vpop.f32.mrb[4].mxu0 }
 0x5ea   :  { %v551_v54 = vpop.f32.mrb[5].mxu0  ;;  %v567_v55 = vadd.f32 %v942_v53, %v44_v20 }
 0x5eb   :  { %v566_v56 = vadd.f32 %v551_v54, %v44_v20  ;;  %v692_v20 = vld [vmem:[%s1415_s2 + $0x28] sm:$0xff]  ;;  %s1212_s2 = smov [#allocation5]  }
 0x5ec   :  { %v1337_v58 = vadd.f32 %v567_v55, %v1255_v1  ;;  %v1053_v46 = vpack.c.bf16 %v692_v20, %v691_v19  ;;  %s791_s7 = sshll.u32 %s1212_s2, 4  ;;  %s792_s7 = int_to_ptr.vmem [resolvable:$true] %s791_s7 }
 0x5ed   :  { %v1334_v57 = vadd.f32 %v566_v56, %v1250_v0  ;;  %s1179_s8 = scalar_lea.vmem %s792_s7, 256  ;;  %p1184_p9 = scmp.lt.s32.totalorder %s792_s7, %s792_s7 }
 0x5ee   :  { %v573_v60 = vsel %vm62_vm0, %v1337_v58, 0.0  ;;  %1054 = vmatprep.subr.bf16.mxu1 %v1053_v46  ;;  %p1180_p8 = scmp.ne.s32.totalorder %s792_s7, %s1179_s8  ;;  %p1185_p10 = scmp.lt.s32.totalorder %s1179_s8, %s1179_s8 }
 0x5ef   :  { %v570_v59 = vsel %vm62_vm0, %v1334_v57, 0.0  ;;  %1056 = vmatpush3.bf16.msra.mxu1 %v1053_v46 }
 0x5f0   :  { %571 = vadd.xlane.f32.xlu1 %v570_v59  ;;  %1058 = vmatprep.subr.bf16.mxu1 %v1057_v33  ;;  %p1186_p11 = por %p1185_p10, %p1184_p9 }
 0x5f2   :  { %p1187_p12 = pnand %p1186_p11, %p1180_p8 }
 0x5f3   :  { %1060 = vmatpush3.bf16.msra.mxu1 %v1057_v33 }
 0x5f4   :  { %574 = vadd.xlane.f32.xlu1 %v573_v60  ;;  %1062 = vmatprep.subr.bf16.mxu1 %v1061_v36 }
 0x5f7   :  { %1064 = vmatpush3.bf16.msra.mxu1 %v1061_v36 }
 0x5f8   :  { %1066 = vmatprep.subr.bf16.mxu1 %v1065_v39 }
 0x5fb   :  { %1068 = vmatpush3.bf16.msra.mxu1 %v1065_v39 }
 0x5fc   :  { %1070 = vmatprep.subr.bf16.mxu1 %v1069_v42 }
 0x5ff   :  { %1072 = vmatpush3.bf16.msra.mxu1 %v1069_v42 }
 0x600   :  { %1074 = vmatprep.subr.bf16.mxu1 %v1073_v45 }
 0x603   :  { %1076 = vmatpush3.bf16.msra.mxu1 %v1073_v45 }
 0x67d   :  { %v572_v2 = vpop.xlane.xlu1 %571 }
 0x67e   :  { %v576_v3 = vmul.f32 0.03125, %v572_v2  ;;  %v705_v2 = vpop.permute.xlu0 %704 }
 0x680   :  { %v578_v0 = vsub.f32 %v1334_v57, %v576_v3 }
 0x681   :  { %v575_v4 = vpop.xlane.xlu1 %574 }
 0x682   :  { %v577_v1 = vmul.f32 0.03125, %v575_v4  ;;  %v580_v5 = vmul.f32 %v578_v0, %v578_v0 }
 0x684   :  { %v579_v6 = vsub.f32 %v1337_v58, %v577_v1  ;;  %v582_v7 = vsel %vm62_vm0, %v580_v5, 0.0 }
 0x685   :  { %583 = vadd.xlane.f32.xlu1 %v582_v7 }
 0x686   :  { %v581_v8 = vmul.f32 %v579_v6, %v579_v6 }
 0x688   :  { %v585_v9 = vsel %vm62_vm0, %v581_v8, 0.0 }
 0x689   :  { %586 = vadd.xlane.f32.xlu1 %v585_v9 }
 0x712   :  { %v584_v21 = vpop.xlane.xlu1 %583 }
 0x713   :  { %v588_v22 = vmul.f32 0.03125, %v584_v21 }
 0x715   :  { %v590_v23 = vadd.f32 1e-05, %v588_v22 }
 0x716   :  { %v587_v24 = vpop.xlane.xlu1 %586 }
 0x717   :  { %1149 = vrsqrt.f32 %v590_v23  ;;  %v589_v25 = vmul.f32 0.03125, %v587_v24 }
 0x719   :  { %v591_v26 = vadd.f32 1e-05, %v589_v25 }
 0x71b   :  { %1151 = vrsqrt.f32 %v591_v26 }
 0x721   :  { %v1150_v27 = vpop.eup %1149 }
 0x722   :  { %v594_v28 = vmul.f32 %v1150_v27, %v578_v0 }
 0x724   :  { %951 = vmatprep.mubr.msk.f32.mxu0 %vm62_vm0, %v594_v28 }
 0x725   :  { %v1152_v29 = vpop.eup %1151 }
 0x726   :  { %v595_v30 = vmul.f32 %v1152_v29, %v579_v6 }
 0x728   :  { %952 = vmatmul.mubr.msk.f32.vlgmr.msra.gmra.mrb[6].mxu0 %vm62_vm0, %v595_v30 }
 0x7fb   :  { %v953_v48 = vpop.f32.mrb[6].mxu0 }
 0x7fc   :  { %v674_v49 = vadd.f32 %v953_v48, %v43_v47  ;;  %v668_v50 = vpop.f32.mrb[7].mxu0 }
 0x7fd   :  { %v669_v51 = vadd.f32 %v668_v50, %v43_v47 }
 0x7fe   :  { %v680_v52 = vmul.f32 0.70710677, %v674_v49  ;;  %v678_v61 = vmul.f32 0.5, %v674_v49 }
 0x7ff   :  { %v679_v53 = vmul.f32 0.70710677, %v669_v51  ;;  %v677_v59 = vmul.f32 0.5, %v669_v51 }
 0x800   :  { %1153 = verf.f32 %v680_v52 }
 0x801   :  { %1155 = verf.f32 %v679_v53 }
 0x80a   :  { %v1154_v54 = vpop.eup %1153 }
 0x80b   :  { %v1156_v55 = vpop.eup %1155  ;;  %v684_v56 = vadd.f32 1.0, %v1154_v54 }
 0x80c   :  { %v683_v60 = vadd.f32 1.0, %v1156_v55 }
 0x80d   :  { %v686_v63 = vmul.f32 %v684_v56, %v678_v61 }
 0x80e   :  { %v685_v62 = vmul.f32 %v683_v60, %v677_v59 }
 0x810   :  { %986 = vmatprep.mubr.f32.mxu1 %v685_v62 }
 0x811   :  { %987 = vmatmul.mubr.f32.vlgmr.msra.gmra.mrb[8].mxu1 %v686_v63 }
 0x8e4   :  { %v988_v3 = vpop.f32.mrb[8].mxu1 }
 0x8e5   :  { %v779_v0 = vadd.f32 %v988_v3, %v705_v2  ;;  %v773_v4 = vpop.f32.mrb[9].mxu1 }
 0x8e6   :  { %v774_v1 = vadd.f32 %v773_v4, %v705_v2 }
 0x8e7   :  { %v783_v5 = vadd.f32 %v779_v0, %v1337_v58 }
 0x8e8   :  { %v782_v6 = vadd.f32 %v774_v1, %v1334_v57 }
 0x8e9   :  { %785 = vst.msk [vmem:[#allocation5 + $0x8] sm:$0xff] %vm62_vm0, %v783_v5 }
 0x8ea   :  { %784 = vst.msk [vmem:[#allocation5] sm:$0xff] %vm62_vm0, %v782_v6 }
 0x8eb   :  { %1190 = shalt.err (!%p1187_p12)
}
 0x8ec   :  { %s1191_s11 = scalar_lea.hbm %s1416_s3, 256 }
 0x8ed   :  { %p1192_p13 = scmp.ne.s32.totalorder %s1416_s3, %s1191_s11  ;;  %p1195_p0 = scmp.lt.u32.totalorder %s1191_s11, %s1416_s3 }
 0x8ef   :  { %p1197_p1 = pnand %p1195_p0, %p1192_p13 }
 0x8f1   :  { %1200 = shalt.err (!%p1197_p1)
}
 0x8f2   :  { %s1213_s16 = smov 128   ;;  %s1214_s17 = smov 8  }
 0x8f3   :  { %797 = dma.vmem_to_hbm [thread:$0]  %s792_s7, 256, %s1416_s3, [#allocation4], %s1213_s16, %s1213_s16, %s1214_s17  }
 0x8f4   :  { %1203 = dma.done.wait [#allocation4], 256  }
 0x8f5   :  { %1204 = vsyncadd [#allocation4], 4294967040 }
 0x8f6   :  { %801 = vsyncpa [#allocation3], 1 }
 0x8f7   :  { %802 = vsyncpa [#allocation4], 1 }

</bundles_post_ra>
